<compile_context>
chip_gen: v6e
topology: v6e:2x2x1
jax: 0.10.0
libtpu: 0.0.40
codegen_flags: <defaults>
</compile_context>

<pallas_src>
import functools

import jax
import jax.numpy as jnp
from jax.experimental import pallas as pl
from jax.experimental.pallas import tpu as pltpu


def _round_up(v, m):
    return -(-v // m) * m


def _decomp_kernel(x_ref, res_ref, mean_ref, xp_ref, *, L, C, kernel_size,
                   chunk_lanes):
    """One (bt, L*C) block: replicate-padded moving mean + residual.

    xp_ref is a VMEM scratch holding the replicate-padded series in f32:
      lanes [base, left)          : `pad` copies of x[:, 0, :]
      lanes [left, left + N)      : x (128-aligned -> dense store)
      lanes [left + N, left+N+halo): `pad` copies of x[:, L-1, :]
    A time shift of j steps is a lane shift of j*C inside xp_ref.
    """
    pad = (kernel_size - 1) // 2
    N = L * C
    halo = pad * C
    left = _round_up(halo, 128)            # x starts at this 128-aligned lane
    base = left - halo                     # padded time-step 0 starts here
    inv_k = 1.0 / kernel_size
    n_chunks = -(-N // chunk_lanes)

    # --- Fill the padded scratch, chunk by chunk (no full-block f32 temp). ---
    for ci in range(n_chunks):
        s = ci * chunk_lanes
        w = min(chunk_lanes, N - s)
        xp_ref[:, left + s:left + s + w] = x_ref[:, s:s + w].astype(jnp.float32)

    if pad > 0:
        first = x_ref[:, 0:C].astype(jnp.float32)        # x[:, 0, :]
        last = x_ref[:, N - C:N].astype(jnp.float32)     # x[:, L-1, :]
        edge_f = jnp.concatenate([first] * pad, axis=1) if pad > 1 else first
        edge_l = jnp.concatenate([last] * pad, axis=1) if pad > 1 else last
        xp_ref[:, base:left] = edge_f
        xp_ref[:, left + N:left + N + halo] = edge_l

    # --- Sliding-window mean: chunked, register-resident accumulation. ---
    n_par = min(4, kernel_size)            # partial accumulators (ILP vs chain)
    for ci in range(n_chunks):
        s = ci * chunk_lanes
        w = min(chunk_lanes, N - s)

        accs = []
        xc = None
        for j in range(kernel_size):
            off = base + s + j * C
            t = xp_ref[:, off:off + w]     # static-offset VMEM load (f32)
            if j == pad:
                xc = t                     # center term == x chunk (exact f32)
            if j < n_par:
                accs.append(t)
            else:
                accs[j % n_par] = accs[j % n_par] + t
        total = accs[0]
        for a in accs[1:]:
            total = total + a

        mean_c = total * inv_k
        mean_ref[:, s:s + w] = mean_c.astype(mean_ref.dtype)
        res_ref[:, s:s + w] = (xc - mean_c).astype(res_ref.dtype)


def _choose_batch_tile(B, N, itemsize, xp_lanes,
                       budget_bytes=16 * 1024 * 1024):
    """Pick the batch tile against the *total* per-block VMEM footprint.

    Footprint per batch row = double-buffered (input + 2 outputs) at the I/O
    dtype + the f32 padded scratch (single-buffered).  Validity is dtype-aware
    (sublane packing: 8 rows f32 / 16 bf16 / 32 int8, or the full dim).
    Among fitting tiles, prefer ones leaving >= 4 grid steps (software
    pipelining + both v7x TensorCores), then >= 2, then the largest.
    """
    per_row = 2 * 3 * N * itemsize + 4 * xp_lanes
    sub = max(8, 32 // itemsize)
    valid = [d for d in range(1, B + 1)
             if B % d == 0 and (d % sub == 0 or d == B)]
    fitting = [d for d in valid if d * per_row <= budget_bytes]
    if not fitting:
        # Guard (review): never pick a tile *larger* than necessary when
        # nothing fits -- take the smallest valid footprint.
        return min(valid)
    for min_steps in (4, 2):
        cands = [d for d in fitting if B // d >= min_steps]
        if cands:
            return max(cands)
    return max(fitting)


def _choose_chunk_lanes(N, bt):
    """Lane-chunk size so one window term (bt x chunk f32) is <= ~32 KiB."""
    target = (32 * 1024) // max(1, bt * 4)
    chunk = max(128, (target // 128) * 128)
    return min(chunk, N)


def series_decomp(x, kernel_size):
    """Pallas TPU implementation of series_decomp.forward.

    x: (B, L, C).  Returns (res, moving_mean), both (B, L, C).
    Requires odd kernel_size (same implicit constraint as the PyTorch module).
    """
    assert kernel_size % 2 == 1, "series_decomp requires odd kernel_size"
    B, L, C = x.shape
    N = L * C
    pad = (kernel_size - 1) // 2
    halo = pad * C
    left = _round_up(halo, 128)
    xp_lanes = left + N + halo

    # Lane-dense view: fold (L, C) onto the minor axis (contiguous reshape).
    x2 = x.reshape(B, N)

    itemsize = jnp.dtype(x.dtype).itemsize
    bt = _choose_batch_tile(B, N, itemsize, xp_lanes)
    chunk = _choose_chunk_lanes(N, bt)
    grid = (B // bt,)

    kernel = functools.partial(_decomp_kernel, L=L, C=C,
                               kernel_size=kernel_size, chunk_lanes=chunk)

    cost = pl.CostEstimate(
        flops=2 * kernel_size * B * N,
        transcendentals=0,
        bytes_accessed=3 * B * N * itemsize,
    )

    res2, mean2 = pl.pallas_call(
        kernel,
        out_shape=(
            jax.ShapeDtypeStruct((B, N), x.dtype),
            jax.ShapeDtypeStruct((B, N), x.dtype),
        ),
        grid_spec=pltpu.PrefetchScalarGridSpec(
            num_scalar_prefetch=0,
            grid=grid,
            in_specs=[pl.BlockSpec((bt, N), lambda b: (b, 0))],
            out_specs=[
                pl.BlockSpec((bt, N), lambda b: (b, 0)),
                pl.BlockSpec((bt, N), lambda b: (b, 0)),
            ],
            scratch_shapes=[pltpu.VMEM((bt, xp_lanes), jnp.float32)],
        ),
        compiler_params=pltpu.CompilerParams(
            dimension_semantics=("parallel",),
            vmem_limit_bytes=32 * 1024 * 1024,
        ),
        cost_estimate=cost,
    )(x2)

    return res2.reshape(B, L, C), mean2.reshape(B, L, C)


def _reference(x, kernel_size):
    """Pure-JAX reference mirroring the PyTorch code (f32 math)."""
    x = x.astype(jnp.float32)
    pad = (kernel_size - 1) // 2
    front = jnp.repeat(x[:, 0:1, :], pad, axis=1)
    end = jnp.repeat(x[:, -1:, :], pad, axis=1)
    xp = jnp.concatenate([front, x, end], axis=1)
    L = x.shape[1]
    windows = jnp.stack([xp[:, j:j + L, :] for j in range(kernel_size)], axis=0)
    mean = jnp.mean(windows, axis=0)
    return x - mean, mean


if __name__ == "__main__":
    key = jax.random.PRNGKey(0)

    # (B, L, C, kernel_size, dtype, atol)
    cases = [
        (2, 16, 8, 5, jnp.float32, 1e-5),
        (4, 96, 7, 25, jnp.float32, 1e-5),     # classic decomposition K=25
        (16, 96, 7, 25, jnp.float32, 1e-5),    # multi-block grid (bt=8)
        (8, 64, 16, 9, jnp.bfloat16, 2e-2),    # dtype-aware tiling path
    ]

    for (B, L, C, K, dt, atol) in cases:
        key, sub = jax.random.split(key)
        x = jax.random.normal(sub, (B, L, C), dtype=jnp.float32).astype(dt)

        res, mean = series_decomp(x, K)
        res = jax.block_until_ready(res)
        mean = jax.block_until_ready(mean)

        res_ref, mean_ref = _reference(x, K)
        assert jnp.allclose(mean.astype(jnp.float32), mean_ref,
                            atol=atol, rtol=atol)
        assert jnp.allclose(res.astype(jnp.float32), res_ref,
                            atol=atol, rtol=atol)
        assert jnp.allclose(
            res.astype(jnp.float32) + mean.astype(jnp.float32),
            x.astype(jnp.float32), atol=3 * atol, rtol=3 * atol)

    print("KERNEL_OK")
</pallas_src>

<mosaic_0001>
module attributes {stable_mosaic.version = 11 : i64} {
  func.func @_decomp_kernel(%arg0: i32, %arg1: memref<2x128xf32, #tpu.memory_space<vmem>>, %arg2: memref<2x128xf32, #tpu.memory_space<vmem>>, %arg3: memref<2x128xf32, #tpu.memory_space<vmem>>, %arg4: memref<2x272xf32, #tpu.memory_space<vmem>>) attributes {dimension_semantics = [#tpu.dimension_semantics<parallel>], iteration_bounds = array<i64: 1>, scalar_prefetch = 0 : i64, scratch_operands = 1 : i64, tpu.core_type = #tpu.core_type<tc>, window_params = [{transform_indices = @transform_0, window_bounds = array<i64: 2, 128>}, {transform_indices = @transform_1, window_bounds = array<i64: 2, 128>}, {transform_indices = @transform_2, window_bounds = array<i64: 2, 128>}]} {
    %c0 = arith.constant 0 : index
    %c0_0 = arith.constant 0 : index
    %0 = vector.load %arg1[%c0, %c0_0] : memref<2x128xf32, #tpu.memory_space<vmem>>, vector<2x128xf32>
    %c0_1 = arith.constant 0 : index
    %c128 = arith.constant 128 : index
    %1 = vector.load %arg4[%c0_1, %c128] : memref<2x272xf32, #tpu.memory_space<vmem>>, vector<2x128xf32>
    tpu.vector_store %arg4[%c0_1, %c128], %0 {strides = array<i32>} : memref<2x272xf32, #tpu.memory_space<vmem>>, vector<2x128xf32>,
    %c0_2 = arith.constant 0 : index
    %c0_3 = arith.constant 0 : index
    %2 = vector.load %arg1[%c0_2, %c0_3] : memref<2x128xf32, #tpu.memory_space<vmem>>, vector<2x8xf32>
    %c0_4 = arith.constant 0 : index
    %c120 = arith.constant 120 : index
    %3 = vector.load %arg1[%c0_4, %c120] : memref<2x128xf32, #tpu.memory_space<vmem>>, vector<2x8xf32>
    %4 = tpu.concatenate %2, %2 in 1 : vector<2x8xf32>, vector<2x8xf32> -> vector<2x16xf32>
    %5 = tpu.concatenate %3, %3 in 1 : vector<2x8xf32>, vector<2x8xf32> -> vector<2x16xf32>
    %c0_5 = arith.constant 0 : index
    %c112 = arith.constant 112 : index
    %6 = vector.load %arg4[%c0_5, %c112] : memref<2x272xf32, #tpu.memory_space<vmem>>, vector<2x16xf32>
    tpu.vector_store %arg4[%c0_5, %c112], %4 {strides = array<i32>} : memref<2x272xf32, #tpu.memory_space<vmem>>, vector<2x16xf32>,
    %c0_6 = arith.constant 0 : index
    %c256 = arith.constant 256 : index
    %7 = vector.load %arg4[%c0_6, %c256] : memref<2x272xf32, #tpu.memory_space<vmem>>, vector<2x16xf32>
    tpu.vector_store %arg4[%c0_6, %c256], %5 {strides = array<i32>} : memref<2x272xf32, #tpu.memory_space<vmem>>, vector<2x16xf32>,
    %c0_7 = arith.constant 0 : index
    %c112_8 = arith.constant 112 : index
    %8 = vector.load %arg4[%c0_7, %c112_8] : memref<2x272xf32, #tpu.memory_space<vmem>>, vector<2x128xf32>
    %c0_9 = arith.constant 0 : index
    %c120_10 = arith.constant 120 : index
    %9 = vector.load %arg4[%c0_9, %c120_10] : memref<2x272xf32, #tpu.memory_space<vmem>>, vector<2x128xf32>
    %c0_11 = arith.constant 0 : index
    %c128_12 = arith.constant 128 : index
    %10 = vector.load %arg4[%c0_11, %c128_12] : memref<2x272xf32, #tpu.memory_space<vmem>>, vector<2x128xf32>
    %c0_13 = arith.constant 0 : index
    %c136 = arith.constant 136 : index
    %11 = vector.load %arg4[%c0_13, %c136] : memref<2x272xf32, #tpu.memory_space<vmem>>, vector<2x128xf32>
    %c0_14 = arith.constant 0 : index
    %c144 = arith.constant 144 : index
    %12 = vector.load %arg4[%c0_14, %c144] : memref<2x272xf32, #tpu.memory_space<vmem>>, vector<2x128xf32>
    %13 = arith.addf %8, %12 : vector<2x128xf32>
    %14 = arith.addf %13, %9 : vector<2x128xf32>
    %15 = arith.addf %14, %10 : vector<2x128xf32>
    %16 = arith.addf %15, %11 : vector<2x128xf32>
    %cst = arith.constant 2.000000e-01 : f32
    %17 = vector.broadcast %cst : f32 to vector<2x128xf32>
    %18 = arith.mulf %16, %17 : vector<2x128xf32>
    %c0_15 = arith.constant 0 : index
    %c0_16 = arith.constant 0 : index
    %19 = vector.load %arg3[%c0_15, %c0_16] : memref<2x128xf32, #tpu.memory_space<vmem>>, vector<2x128xf32>
    tpu.vector_store %arg3[%c0_15, %c0_16], %18 {strides = array<i32>} : memref<2x128xf32, #tpu.memory_space<vmem>>, vector<2x128xf32>,
    %20 = arith.subf %10, %18 : vector<2x128xf32>
    %c0_17 = arith.constant 0 : index
    %c0_18 = arith.constant 0 : index
    %21 = vector.load %arg2[%c0_17, %c0_18] : memref<2x128xf32, #tpu.memory_space<vmem>>, vector<2x128xf32>
    tpu.vector_store %arg2[%c0_17, %c0_18], %20 {strides = array<i32>} : memref<2x128xf32, #tpu.memory_space<vmem>>, vector<2x128xf32>,
    return
  }
  func.func @transform_0(%arg0: i32) -> (i32, i32) {
    %c0_i32 = arith.constant 0 : i32
    %c0_i32_0 = arith.constant 0 : i32
    return %arg0, %c0_i32 : i32, i32
  }
  func.func @transform_1(%arg0: i32) -> (i32, i32) {
    %c0_i32 = arith.constant 0 : i32
    %c0_i32_0 = arith.constant 0 : i32
    return %arg0, %c0_i32 : i32, i32
  }
  func.func @transform_2(%arg0: i32) -> (i32, i32) {
    %c0_i32 = arith.constant 0 : i32
    %c0_i32_0 = arith.constant 0 : i32
    return %arg0, %c0_i32 : i32, i32
  }
}

</mosaic_0001>

<bundles_post_ra>
// kernel: tpu_custom_call.1
= control target key start
LH: loop header
LB: loop body
LE: loop exit
PB: predicated region body
PF: predicated region fallthrough
CT: control target
= control target key end

     0   :  { %8 = vsyncpa [#allocation4], 0  ;;  %s254_s0 = inlined_call_operand.hbm [shape: f32[2,128], index: 0, kind: input, shape index: {}]   ;;  %s255_s1 = inlined_call_operand.hbm [shape: f32[2,128], index: 1, kind: output, shape index: {0}]   ;;  %s256_s2 = inlined_call_operand.hbm [shape: f32[2,128], index: 2, kind: output, shape index: {1}]  }
   0x1   :  { %9 = vsyncpa [#allocation5], 0 }
   0x2   :  { %10 = vsyncpa [#allocation8], 0  ;;  %s216_s9 = smov [#allocation3]  }
   0x3   :  { %s17_s10 = sshll.u32 %s216_s9, 4  ;;  %s18_s10 = int_to_ptr.vmem [resolvable:$true] %s17_s10 }
   0x4   :  { %s158_s11 = scalar_lea.vmem %s18_s10, 32  ;;  %p163_p1 = scmp.lt.s32.totalorder %s18_s10, %s18_s10 }
   0x5   :  { %p159_p0 = scmp.ne.s32.totalorder %s18_s10, %s158_s11  ;;  %p164_p2 = scmp.lt.s32.totalorder %s158_s11, %s158_s11 }
   0x7   :  { %p165_p3 = por %p164_p2, %p163_p1 }
   0x9   :  { %p166_p4 = pnand %p165_p3, %p159_p0 }
   0xb   :  { %169 = shalt.err (!%p166_p4)
}
   0xc   :  { %20 = dma.hbm_to_vmem [thread:$0]  %s254_s0, 32, %s18_s10, [#allocation4]  }
   0xd   :  { %210 = dma.done.wait [#allocation4], 32  }
   0xe   :  { %211 = vsyncadd [#allocation4], 4294967264  ;;  %v26_v0 = vld [vmem:[#allocation3] sm:$0x3]  ;;  %s217_s14 = smov 8   ;;  %s218_s15 = smov 16   ;;  %v41_v4 = vlaneseq }
   0xf   :  { %v24_v1 = vld [vmem:[#allocation3] sm:$0x3]  ;;  %28 = vrot.lane.b32.xlu0 %v26_v0, %s217_s14  ;;  %v219_v2 = vmov 1983009808   ;;  %vm31_vm0 = vcmask 64512   ;;  %vm50_vm1 = vcmask 123904  }
  0x10   :  { %25 = vst [vmem:[#allocation2 + $0x2] sm:$0x3] %v24_v1  ;;  %v39_v3 = vunpack.c.l.s4 %v219_v2  ;;  %v42_v6 = vshrl.u32 %v41_v4, 7  ;;  %s220_s0 = smov 112   ;;  %s221_s16 = smov 96   ;;  %vm48_vm2 = vcmask 1042304  }
  0x11   :  { %s222_s17 = smov 120   ;;  %s223_s18 = smov 104   ;;  %vm59_vm3 = vcmask 785408   ;;  %vm67_vm4 = vcmask 982016   ;;  %vm75_vm5 = vcmask 916480   ;;  %vm82_vm6 = vcmask 850944  }
  0x12   :  { %v40_v5 = vunpack.c.0.s8 %v39_v3  ;;  %vm100_vm7 = vcmask 130048   ;;  %s224_s19 = smov [#allocation6]   ;;  %s225_s21 = smov [#allocation7]  }
  0x13   :  { %33 = vrot.lane.b32.xlu0 %v26_v0, %s218_s15  ;;  %s117_s20 = sshll.u32 %s224_s19, 4  ;;  %s127_s22 = sshll.u32 %s225_s21, 4  ;;  %s118_s20 = int_to_ptr.vmem [resolvable:$true] %s117_s20  ;;  %s128_s22 = int_to_ptr.vmem [resolvable:$true] %s127_s22 }
  0x14   :  { %v43_v7 = vsub.s32 %v40_v5, %v42_v6  ;;  %s170_s23 = scalar_lea.vmem %s118_s20, 32  ;;  %p175_p6 = scmp.lt.s32.totalorder %s118_s20, %s118_s20 }
  0x15   :  { %p171_p5 = scmp.ne.s32.totalorder %s118_s20, %s170_s23  ;;  %p176_p7 = scmp.lt.s32.totalorder %s170_s23, %s170_s23 }
  0x17   :  { %v53_v14 = vld [vmem:[#allocation2 + $0x2] sm:$0x3]  ;;  %p177_p8 = por %p176_p7, %p175_p6 }
  0x19   :  { %p178_p9 = pnand %p177_p8, %p171_p5 }
  0x81   :  { %v29_v8 = vpop.permute.xlu0 %28 }
  0x82   :  { %v32_v9 = vsel %vm31_vm0, %v26_v0, %v29_v8 }
  0x83   :  { %v44_v10 = vrot.slane %v32_v9, %v43_v7 }
  0x85   :  { %45 = vrot.lane.b32.xlu1 %v44_v10, %s220_s0  ;;  %v34_v11 = vpop.permute.xlu0 %33 }
  0x86   :  { %v36_v12 = vsel %vm31_vm0, %v29_v8, %v34_v11 }
  0x87   :  { %51 = vst.msk [vmem:[#allocation2 + $0x4] sm:$0x3] %vm50_vm1, %v36_v12 }
  0x8e   :  { %v54_v13 = vld [vmem:[#allocation2 + $0x2] sm:$0xf] }
  0x8f   :  { %56 = vrot.lane.b32.xlu1 %v54_v13, %s221_s16 }
  0x93   :  { %72 = vrot.lane.b32.xlu1 %v53_v14, %s220_s0 }
  0xf7   :  { %v46_v15 = vpop.permute.xlu1 %45 }
  0xf8   :  { %49 = vst.msk [vmem:[#allocation2] sm:$0x3] %vm48_vm2, %v46_v15 }
  0xff   :  { %v52_v16 = vld [vmem:[#allocation2] sm:$0xf] }
 0x100   :  { %64 = vrot.lane.b32.xlu0 %v52_v16, %s222_s17 }
 0x101   :  { %v57_v17 = vpop.permute.xlu1 %56 }
 0x102   :  { %v58_v18 = vrot.slane %v57_v17, 6 }
 0x104   :  { %79 = vrot.lane.b32.xlu0 %v54_v13, %s223_s18  ;;  %v60_v20 = vsel %vm59_vm3, %v58_v18, %v57_v17 }
 0x105   :  { %v73_v19 = vpop.permute.xlu1 %72  ;;  %v62_v24 = vadd.f32 %v60_v20, %v52_v16 }
 0x106   :  { %v74_v22 = vrot.slane %v73_v19, 6 }
 0x108   :  { %v76_v28 = vsel %vm75_vm5, %v74_v22, %v73_v19 }
 0x172   :  { %v65_v21 = vpop.permute.xlu0 %64 }
 0x173   :  { %v66_v23 = vrot.slane %v65_v21, 2 }
 0x175   :  { %v68_v25 = vsel %vm67_vm4, %v65_v21, %v66_v23 }
 0x176   :  { %v70_v26 = vadd.f32 %v68_v25, %v62_v24  ;;  %v80_v27 = vpop.permute.xlu0 %79 }
 0x177   :  { %v81_v29 = vrot.slane %v80_v27, 6 }
 0x178   :  { %v78_v30 = vadd.f32 %v76_v28, %v70_v26 }
 0x179   :  { %v83_v31 = vsel %vm82_vm6, %v81_v29, %v80_v27 }
 0x17a   :  { %v85_v32 = vadd.f32 %v83_v31, %v78_v30 }
 0x17c   :  { %v86_v33 = vmul.f32 0.2, %v85_v32 }
 0x17e   :  { %104 = vrot.lane.b32.xlu1 %v86_v33, %s218_s15  ;;  %v94_v34 = vrot.slane %v86_v33, %v43_v7 }
 0x180   :  { %96 = vrot.lane.b32.xlu0 %v94_v34, %s218_s15  ;;  %v95_v35 = vcombine.high %v94_v34, %v94_v34 }
 0x182   :  { %98 = vrot.lane.b32.xlu1 %v95_v35, %s218_s15 }
 0x1f0   :  { %v105_v36 = vpop.permute.xlu1 %104 }
 0x1f1   :  { %v106_v37 = vrot.slane %v105_v36, 2 }
 0x1f2   :  { %v97_v40 = vpop.permute.xlu0 %96 }
 0x1f3   :  { %v107_v38 = vsel %vm100_vm7, %v105_v36, %v106_v37 }
 0x1f4   :  { %v109_v39 = vsub.f32 %v53_v14, %v107_v38  ;;  %v99_v41 = vpop.permute.xlu1 %98 }
 0x1f5   :  { %v101_v42 = vsel %vm100_vm7, %v97_v40, %v99_v41 }
 0x1f6   :  { %110 = vst [vmem:[#allocation6] sm:$0x3] %v109_v39  ;;  %103 = vst [vmem:[#allocation7] sm:$0x3] %v101_v42 }
 0x1f7   :  { %181 = shalt.err (!%p178_p9)
}
 0x1f8   :  { %120 = dma.vmem_to_hbm [thread:$0]  %s118_s20, 32, %s255_s1, [#allocation5]  }
 0x1f9   :  { %s190_s26 = scalar_lea.vmem %s128_s22, 32  ;;  %p195_p11 = scmp.lt.s32.totalorder %s128_s22, %s128_s22 }
 0x1fa   :  { %p191_p10 = scmp.ne.s32.totalorder %s128_s22, %s190_s26  ;;  %p196_p12 = scmp.lt.s32.totalorder %s190_s26, %s190_s26 }
 0x1fc   :  { %p197_p13 = por %p196_p12, %p195_p11 }
 0x1fe   :  { %p198_p0 = pnand %p197_p13, %p191_p10 }
 0x200   :  { %201 = shalt.err (!%p198_p0)
}
 0x201   :  { %130 = dma.vmem_to_hbm [thread:$0]  %s128_s22, 32, %s256_s2, [#allocation8]  }
 0x202   :  { %212 = dma.done.wait [#allocation5], 32  }
 0x203   :  { %213 = vsyncadd [#allocation5], 4294967264 }
 0x204   :  { %214 = dma.done.wait [#allocation8], 32  }
 0x205   :  { %215 = vsyncadd [#allocation8], 4294967264 }
 0x206   :  { %137 = vsyncpa [#allocation4], 1 }
 0x207   :  { %138 = vsyncpa [#allocation5], 1 }
 0x208   :  { %139 = vsyncpa [#allocation8], 1 }

</bundles_post_ra>
